<compile_context>
chip_gen: v5e
topology: v5e:2x2
jax: 0.10.0
libtpu: 0.0.40
codegen_flags: <defaults>
</compile_context>

<pallas_src>
import functools

import jax
import jax.numpy as jnp
from jax.experimental import pallas as pl
from jax.experimental.pallas import tpu as pltpu

_LANES = 128
_ROW_ALIGN = 32  # multiple of the f32/bf16/int8 sublane tiles -> safe block granularity
_NEG_LOG_1E4 = 9.210340371976184  # -log(1e-4) == -log(clamp(one_hot==0, 1e-4, 1))


def _fused_elem_loss(p, y, alpha_over_n, beta_over_n):
    """Per-element alpha/n * BCE + beta/n * reverse-BCE for hard labels y in {0,1}."""
    p = p.astype(jnp.float32)
    y = y.astype(jnp.float32)
    p_err = jnp.abs(y - p)                                  # 1 - prob(correct class)
    bce_i = -jnp.maximum(jnp.log(1.0 - p_err), -100.0)      # PyTorch BCELoss clamps log at -100
    rbce_i = _NEG_LOG_1E4 * jnp.maximum(p_err, 1e-7)        # -log(1e-4)*clamp(p_wrong, 1e-7, 1)
    return alpha_over_n * bce_i + beta_over_n * rbce_i


def _bsce_block_kernel(pred_ref, labels_ref, out_ref, *, alpha_over_n,
                       beta_over_n, valid_rows, block_rows, mask_last):
    """One (block_rows, 128) row-block -> one SMEM partial sum."""
    contrib = _fused_elem_loss(pred_ref[...], labels_ref[...],
                               alpha_over_n, beta_over_n)

    if not mask_last:
        # Every block (including the last) is fully valid: plain reduction.
        out_ref[0, 0] = jnp.sum(contrib)
    else:
        i = pl.program_id(0)
        is_last = i == pl.num_programs(0) - 1

        @pl.when(jnp.logical_not(is_last))
        def _():
            out_ref[0, 0] = jnp.sum(contrib)

        @pl.when(is_last)
        def _():
            # Only the ragged last block carries the row-validity mask; garbage
            # rows (Pallas partial-block reads) may be NaN but are select-ed away.
            row_ids = jax.lax.broadcasted_iota(jnp.int32, contrib.shape, 0)
            valid = (i * block_rows + row_ids) < valid_rows
            out_ref[0, 0] = jnp.sum(jnp.where(valid, contrib, 0.0))


def bsce_loss(pred, labels, alpha, beta, *, block_rows=4096):
    """pred, labels: (N, 1). pred = probabilities in [0, 1]; labels = hard {0, 1}.

    Returns scalar f32: alpha * BCE(pred, labels) + beta * mean(reverse-BCE).
    """
    n = pred.shape[0]
    flat_p = pred.reshape(-1)     # (N, 1) -> (N,) is a free bitcast reshape
    flat_y = labels.reshape(-1)

    n_rows = n // _LANES
    bulk = n_rows * _LANES
    rem = n - bulk

    alpha_over_n = float(alpha) / n
    beta_over_n = float(beta) / n

    total = jnp.zeros((), jnp.float32)

    if n_rows > 0:
        # --- choose the row-block size ---------------------------------------
        block_rows = max(_ROW_ALIGN, (block_rows // _ROW_ALIGN) * _ROW_ALIGN)
        if n_rows <= 2 * _ROW_ALIGN:
            # Small input: one full-extent block, no masking needed at all.
            brows = n_rows
        else:
            # Guarantee >= 2 blocks so the "parallel" axis can split across the
            # two v7x TensorCores, while keeping blocks as large as possible.
            half = -(-n_rows // 2)
            half = -(-half // _ROW_ALIGN) * _ROW_ALIGN
            brows = min(block_rows, half)

        num_blocks = -(-n_rows // brows)
        mask_last = (n_rows % brows) != 0

        # Zero-copy reshape when N is 128-aligned; otherwise a single bulk slice
        # (no pad values are materialized, tail handled below in plain JAX).
        p2 = (flat_p if rem == 0 else flat_p[:bulk]).reshape(n_rows, _LANES)
        y2 = (flat_y if rem == 0 else flat_y[:bulk]).reshape(n_rows, _LANES)

        kernel = functools.partial(
            _bsce_block_kernel,
            alpha_over_n=alpha_over_n,
            beta_over_n=beta_over_n,
            valid_rows=n_rows,
            block_rows=brows,
            mask_last=mask_last,
        )

        partials = pl.pallas_call(
            kernel,
            out_shape=jax.ShapeDtypeStruct((num_blocks, 1), jnp.float32),
            grid=(num_blocks,),
            in_specs=[
                pl.BlockSpec((brows, _LANES), lambda i: (i, 0)),
                pl.BlockSpec((brows, _LANES), lambda i: (i, 0)),
            ],
            out_specs=pl.BlockSpec(
                (1, 1), lambda i: (i, 0), memory_space=pltpu.MemorySpace.SMEM
            ),
            compiler_params=pltpu.CompilerParams(
                dimension_semantics=("parallel",),
                vmem_limit_bytes=32 * 1024 * 1024,
            ),
        )(p2, y2)

        # Tiny final combine of per-block partial sums (keeps error bounded).
        total = total + jnp.sum(partials)

    if rem > 0:
        # <128-element ragged tail: negligible work, done in plain JAX.
        total = total + jnp.sum(
            _fused_elem_loss(flat_p[bulk:], flat_y[bulk:], alpha_over_n, beta_over_n)
        )

    return total


def _bsce_ref(pred, labels, alpha, beta):
    """Pure-JAX reference mirroring the PyTorch forward."""
    p = pred.astype(jnp.float32)
    y = labels.astype(jnp.float32)
    bce = jnp.mean(
        -(y * jnp.maximum(jnp.log(p), -100.0)
          + (1.0 - y) * jnp.maximum(jnp.log(1.0 - p), -100.0))
    )
    pred_cat = jnp.clip(jnp.concatenate([1.0 - p, p], axis=1), 1e-7, 1.0)   # (N, 2)
    oh = jax.nn.one_hot(labels.astype(jnp.int32).squeeze(1), 2, dtype=jnp.float32)
    oh = jnp.clip(oh, 1e-4, 1.0)
    rbce = -jnp.sum(pred_cat * jnp.log(oh), axis=1)
    return alpha * bce + beta * jnp.mean(rbce)


if __name__ == "__main__":
    ALPHA, BETA = 1.0, 0.5
    loss_fn = jax.jit(functools.partial(bsce_loss, alpha=ALPHA, beta=BETA))

    key = jax.random.PRNGKey(0)
    # 1100: single block + ragged JAX tail; 4096: exact 128-multiple (zero-copy,
    # no tail); 10000: 2 parallel blocks + masked last block + ragged tail.
    for n in (1100, 4096, 10000):
        key, k1, k2 = jax.random.split(key, 3)
        logits = jax.random.normal(k1, (n, 1), dtype=jnp.float32)
        pred = jax.nn.sigmoid(logits)                                 # probs in (0, 1)
        # Labels produced directly in a narrow dtype (cast to f32 in-kernel).
        labels = jax.random.bernoulli(k2, 0.5, (n, 1)).astype(jnp.bfloat16)

        loss = loss_fn(pred, labels)
        jax.block_until_ready(loss)

        ref = _bsce_ref(pred, labels, ALPHA, BETA)
        assert jnp.allclose(loss, ref, rtol=1e-4, atol=1e-4), (n, loss, ref)

    print("KERNEL_OK")
</pallas_src>

<mosaic_0001>
module attributes {stable_mosaic.version = 11 : i64} {
  func.func @_bsce_block_kernel(%arg0: i32, %arg1: memref<8x128xf32, #tpu.memory_space<vmem>>, %arg2: memref<8x128xbf16, #tpu.memory_space<vmem>>, %arg3: memref<1x1xf32, #tpu.memory_space<smem>>) attributes {dimension_semantics = [#tpu.dimension_semantics<parallel>], iteration_bounds = array<i64: 1>, scalar_prefetch = 0 : i64, scratch_operands = 0 : i64, tpu.core_type = #tpu.core_type<tc>, window_params = [{transform_indices = @transform_0, window_bounds = array<i64: 8, 128>}, {transform_indices = @transform_1, window_bounds = array<i64: 8, 128>}, {transform_indices = @transform_2, window_bounds = array<i64: 1, 1>}]} {
    %c0 = arith.constant 0 : index
    %c0_0 = arith.constant 0 : index
    %0 = vector.load %arg1[%c0, %c0_0] : memref<8x128xf32, #tpu.memory_space<vmem>>, vector<8x128xf32>
    %c0_1 = arith.constant 0 : index
    %c0_2 = arith.constant 0 : index
    %1 = vector.load %arg2[%c0_1, %c0_2] : memref<8x128xbf16, #tpu.memory_space<vmem>>, vector<8x128xbf16>
    %2 = arith.extf %1 : vector<8x128xbf16> to vector<8x128xf32>
    %3 = arith.subf %2, %0 : vector<8x128xf32>
    %4 = math.absf %3 : vector<8x128xf32>
    %cst = arith.constant 1.000000e+00 : f32
    %5 = vector.broadcast %cst : f32 to vector<8x128xf32>
    %6 = arith.subf %5, %4 : vector<8x128xf32>
    %7 = math.log %6 : vector<8x128xf32>
    %cst_3 = arith.constant -1.000000e+02 : f32
    %8 = vector.broadcast %cst_3 : f32 to vector<8x128xf32>
    %9 = arith.maximumf %7, %8 : vector<8x128xf32>
    %cst_4 = arith.constant 0.000000e+00 : f32
    %10 = vector.broadcast %cst_4 : f32 to vector<8x128xf32>
    %11 = arith.subf %10, %9 : vector<8x128xf32>
    %cst_5 = arith.constant 1.000000e-07 : f32
    %12 = vector.broadcast %cst_5 : f32 to vector<8x128xf32>
    %13 = arith.maximumf %4, %12 : vector<8x128xf32>
    %cst_6 = arith.constant 9.21034049 : f32
    %14 = vector.broadcast %cst_6 : f32 to vector<8x128xf32>
    %15 = arith.mulf %14, %13 : vector<8x128xf32>
    %cst_7 = arith.constant 9.09090915E-4 : f32
    %16 = vector.broadcast %cst_7 : f32 to vector<8x128xf32>
    %17 = arith.mulf %16, %11 : vector<8x128xf32>
    %cst_8 = arith.constant 4.54545458E-4 : f32
    %18 = vector.broadcast %cst_8 : f32 to vector<8x128xf32>
    %19 = arith.mulf %18, %15 : vector<8x128xf32>
    %20 = arith.addf %17, %19 : vector<8x128xf32>
    %21 = vector.shape_cast %20 : vector<8x128xf32> to vector<1x8x128xf32>
    %cst_9 = arith.constant dense<0.000000e+00> : vector<1xf32>
    %22 = vector.multi_reduction <add>, %21, %cst_9 [1, 2] : vector<1x8x128xf32> to vector<1xf32>
    %23 = vector.shape_cast %22 : vector<1xf32> to vector<1x1x1xf32>
    %24 = vector.extract %23[0, 0, 0] : f32 from vector<1x1x1xf32>
    %c0_10 = arith.constant 0 : index
    %c0_11 = arith.constant 0 : index
    %25 = memref.load %arg3[%c0_10, %c0_11] : memref<1x1xf32, #tpu.memory_space<smem>>
    memref.store %24, %arg3[%c0_10, %c0_11] : memref<1x1xf32, #tpu.memory_space<smem>>
    return
  }
  func.func @transform_0(%arg0: i32) -> (i32, i32) {
    %c0_i32 = arith.constant 0 : i32
    %c0_i32_0 = arith.constant 0 : i32
    return %arg0, %c0_i32 : i32, i32
  }
  func.func @transform_1(%arg0: i32) -> (i32, i32) {
    %c0_i32 = arith.constant 0 : i32
    %c0_i32_0 = arith.constant 0 : i32
    return %arg0, %c0_i32 : i32, i32
  }
  func.func @transform_2(%arg0: i32) -> (i32, i32) {
    %c0_i32 = arith.constant 0 : i32
    %c0_i32_0 = arith.constant 0 : i32
    return %arg0, %c0_i32 : i32, i32
  }
}

</mosaic_0001>

<bundles_post_ra>
// kernel: bsce_loss.1
= control target key start
LH: loop header
LB: loop body
LE: loop exit
PB: predicated region body
PF: predicated region fallthrough
CT: control target
= control target key end

     0   :  { %s97_s0 = inlined_call_operand.vmem [shape: f32[8,128], index: 0, kind: input, shape index: {}]   ;;  %s98_s1 = inlined_call_operand.vmem [shape: bf16[8,128], index: 1, kind: input, shape index: {}]   ;;  %s99_s2 = inlined_call_operand.hbm [shape: f32[1,1], index: 2, kind: output, shape index: {}]  }
   0x1   :  { %v12_v0 = vld [vmem:[%s97_s0] sm:$0xff] }
   0x2   :  { %v13_v1 = vld [vmem:[%s98_s1] sm:$0xf] }
   0x3   :  { %7 = vsyncpa [#allocation3], 0  ;;  %v14_v2 = vunpack.c.l.bf16 %v13_v1  ;;  %s43_s13 = sshll.u32 %s99_s2, 4  ;;  %s72_s15 = smov [#allocation2]   ;;  %s44_s13 = int_to_ptr.hbm [resolvable:$true] %s43_s13 }
   0x5   :  { %v15_v3 = vsub.f32 %v14_v2, %v12_v0 }
   0x7   :  { %v16_v4 = vand.u32 2147483647, %v15_v3 }
   0x9   :  { %v17_v5 = vsub.f32 1.0, %v16_v4  ;;  %v22_v6 = vmax.f32 %v16_v4, 1e-07 }
   0xb   :  { %56 = vlog2.f32 %v17_v5  ;;  %v23_v9 = vmul.f32 9.2103405, %v22_v6 }
   0xd   :  { %v25_v12 = vmul.f32 0.00045454546, %v23_v9 }
  0x11   :  { %v57_v7 = vpop.eup %56 }
  0x12   :  { %v19_v8 = vmul.f32 0.6931472, %v57_v7 }
  0x14   :  { %v20_v10 = vmax.f32 %v19_v8, -100.0 }
  0x16   :  { %v21_v11 = vsub.f32 0.0, %v20_v10 }
  0x18   :  { %v24_v13 = vmul.f32 0.0009090909, %v21_v11 }
  0x1a   :  { %v26_v14 = vadd.f32 %v25_v12, %v24_v13 }
  0x1c   :  { %27 = vadd.xlane.f32.xlu0 %v26_v14 }
  0x8f   :  { %v28_v15 = vpop.xlane.xlu0 %27 }
  0x90   :  { %v29_v16 = vrot.slane %v28_v15, 4 }
  0x92   :  { %v30_v17 = vadd.f32 %v29_v16, %v28_v15 }
  0x94   :  { %v31_v18 = vrot.slane %v30_v17, 2 }
  0x96   :  { %v32_v19 = vadd.f32 %v31_v18, %v30_v17 }
  0x98   :  { %v33_v20 = vrot.slane %v32_v19, 1 }
  0x9a   :  { %v34_v21 = vadd.f32 %v33_v20, %v32_v19 }
  0x9c   :  { %53 = vpush %v34_v21 }
  0xcd   :  { %s54_s14 = spop %53 }
  0xce   :  { %37 = sst [smem:[#allocation2]] %s54_s14 }
  0xcf   :  { %46 = dma.smem_to_hbm %s72_s15, 16, %s44_s13, [#allocation3]  }
  0xd0   :  { %70 = dma.done.wait [#allocation3], 16  }
  0xd1   :  { %71 = vsyncadd [#allocation3], 4294967280 }
  0xd2   :  { %51 = sfence }
  0xd3   :  { %52 = vsyncpa [#allocation3], 1 }

</bundles_post_ra>
